<compile_context>
chip_gen: v7x
topology: tpu7x:2x2x1
jax: 0.10.0
libtpu: 0.0.40
codegen_flags: <defaults>
</compile_context>

<pallas_src>
import jax
import jax.numpy as jnp
from jax.experimental import pallas as pl
from jax.experimental.pallas import tpu as pltpu


def _round_up(x, m):
    return (x + m - 1) // m * m


def conv_bn_kernel(patches_ref, w_ref, scale_ref, bias_ref, out_ref, acc_ref):
    # bf16 x bf16 -> f32 accumulate on the MXU; per-channel BN scale/bias are
    # applied in f32 in the epilogue (free VALU work under the MXU).
    k = pl.program_id(2)

    @pl.when(k == 0)
    def _():
        acc_ref[...] = jnp.zeros_like(acc_ref)

    acc_ref[...] += jnp.dot(patches_ref[...], w_ref[...],
                            preferred_element_type=jnp.float32)

    @pl.when(k == pl.num_programs(2) - 1)
    def _():
        out_ref[...] = (acc_ref[...] * scale_ref[...]
                        + bias_ref[...]).astype(out_ref.dtype)


def conv_norm_layer(x_nchw, weight, gamma, beta, running_mean, running_var,
                    stride=1, eps=1e-5, tile_m=512):
    """ConvNormLayer forward. x_nchw: (N, Cin, H, W); weight: (Cout, Cin, K, K)."""
    N, Cin, H, W = x_nchw.shape
    Cout, _, K, _ = weight.shape
    pad = (K - 1) // 2
    OH = (H + 2 * pad - K) // stride + 1
    OW = (W + 2 * pad - K) // stride + 1
    M = N * OH * OW
    Kc = K * K * Cin

    # --- glue: im2col in bf16 (taps ordered (kh, kw, cin)) ---
    # TODO(synk): replace with in-kernel tap accumulation over padded NHWC in HBM.
    x = jnp.transpose(x_nchw, (0, 2, 3, 1)).astype(jnp.bfloat16)      # NHWC bf16
    x = jnp.pad(x, ((0, 0), (pad, pad), (pad, pad), (0, 0)))
    taps = []
    for kh in range(K):
        for kw in range(K):
            taps.append(x[:, kh:kh + OH * stride:stride,
                          kw:kw + OW * stride:stride, :])             # (N,OH,OW,Cin)
    patches = jnp.concatenate(taps, axis=-1).reshape(M, Kc)

    # weight (Cout,Cin,K,K) -> (K,K,Cin,Cout) -> (Kc,Cout) bf16.
    w_mat = jnp.transpose(weight, (2, 3, 1, 0)).reshape(Kc, Cout).astype(jnp.bfloat16)
    # BN affine kept in f32 for the epilogue.
    scale = gamma.astype(jnp.float32) * jax.lax.rsqrt(
        running_var.astype(jnp.float32) + eps)
    bias = beta.astype(jnp.float32) - running_mean.astype(jnp.float32) * scale

    # --- tiling ---
    Cp = _round_up(Cout, 128)            # lane-dense output columns
    Kcp0 = _round_up(Kc, 128)            # lane-dense / sublane-clean contraction
    weight_resident_limit = 8 * 1024 * 1024
    if Kcp0 <= 6144 and Kcp0 * Cp * 2 <= weight_resident_limit:
        # Whole bf16 weight stays resident in VMEM: constant block index -> the
        # (Kcp, Cp) tile is DMA'd once and reused by every M tile.
        Kcp, tk, tn = Kcp0, Kcp0, Cp
    else:
        # K-tiled accumulation bounds VMEM for very large Cin*K*K layers.
        tk = 512
        Kcp = _round_up(Kc, tk)
        tn = min(256, Cp)

    # Big M tiles for arithmetic intensity, but keep >=2 parallel blocks so the
    # grid can shard across both TensorCores on v7x.
    tm = min(tile_m, _round_up(M, 8))
    if _round_up(M, tm) // tm < 2 and M > 8:
        tm = _round_up(-(-M // 2), 8)
    Mp = _round_up(M, tm)

    patches = jnp.pad(patches, ((0, Mp - M), (0, Kcp - Kc)))
    w_mat = jnp.pad(w_mat, ((0, Kcp - Kc), (0, Cp - Cout)))
    scale = jnp.pad(scale, (0, Cp - Cout)).reshape(1, Cp)             # f32
    bias = jnp.pad(bias, (0, Cp - Cout)).reshape(1, Cp)               # f32

    grid = (Mp // tm, Cp // tn, Kcp // tk)
    cost = pl.CostEstimate(
        flops=2 * Mp * Kcp * Cp,
        transcendentals=0,
        bytes_accessed=(patches.size * 2 + w_mat.size * 2
                        + (scale.size + bias.size) * 4 + Mp * Cp * 2),
    )

    out = pl.pallas_call(
        conv_bn_kernel,
        out_shape=jax.ShapeDtypeStruct((Mp, Cp), jnp.bfloat16),       # bf16 writeback
        grid_spec=pltpu.PrefetchScalarGridSpec(
            num_scalar_prefetch=0,
            grid=grid,
            in_specs=[
                pl.BlockSpec((tm, tk), lambda i, j, k: (i, k)),       # patches tile
                pl.BlockSpec((tk, tn), lambda i, j, k: (k, j)),       # weight tile
                pl.BlockSpec((1, tn), lambda i, j, k: (0, j)),        # BN scale
                pl.BlockSpec((1, tn), lambda i, j, k: (0, j)),        # BN bias
            ],
            out_specs=pl.BlockSpec((tm, tn), lambda i, j, k: (i, j)),
            scratch_shapes=[pltpu.VMEM((tm, tn), jnp.float32)],       # f32 accumulator
        ),
        compiler_params=pltpu.CompilerParams(
            dimension_semantics=("parallel", "parallel", "arbitrary"),
            vmem_limit_bytes=48 * 1024 * 1024),
        cost_estimate=cost,
    )(patches, w_mat, scale, bias)

    out = out[:M, :Cout].reshape(N, OH, OW, Cout)
    # TODO(synk): emit NHWC and fuse this transpose into the consumer when possible.
    return jnp.transpose(out, (0, 3, 1, 2)).astype(x_nchw.dtype)      # back to NCHW


if __name__ == "__main__":
    key = jax.random.PRNGKey(0)
    k_x, k_w, k_g, k_b, k_m, k_v = jax.random.split(key, 6)

    # ConvNormLayer(ch_in=4, ch_out=8, filter_size=3, stride=1)
    N, Cin, H, W = 2, 4, 16, 16
    Cout, K, stride = 8, 3, 1

    x = jax.random.normal(k_x, (N, Cin, H, W), jnp.float32)
    weight = jax.random.normal(k_w, (Cout, Cin, K, K), jnp.float32) * 0.1
    gamma = jax.random.normal(k_g, (Cout,), jnp.float32) * 0.1 + 1.0
    beta = jax.random.normal(k_b, (Cout,), jnp.float32) * 0.1
    running_mean = jax.random.normal(k_m, (Cout,), jnp.float32) * 0.1
    running_var = jax.random.uniform(k_v, (Cout,), jnp.float32, 0.5, 1.5)

    y = conv_norm_layer(x, weight, gamma, beta, running_mean, running_var,
                        stride=stride)
    y = jax.block_until_ready(y)

    # reference check (plain JAX / XLA, full f32)
    pad = (K - 1) // 2
    ref = jax.lax.conv_general_dilated(
        x, weight, window_strides=(stride, stride),
        padding=[(pad, pad), (pad, pad)],
        dimension_numbers=("NCHW", "OIHW", "NCHW"))
    ref = (ref - running_mean[None, :, None, None]) / jnp.sqrt(
        running_var[None, :, None, None] + 1e-5)
    ref = ref * gamma[None, :, None, None] + beta[None, :, None, None]

    assert y.shape == (N, Cout, H, W)
    # bf16 operands (f32 accumulation, f32 BN epilogue) vs f32 reference
    assert jnp.allclose(y, ref, atol=3e-2, rtol=3e-2), "mismatch vs reference"
    print("KERNEL_OK")
</pallas_src>

<mosaic_0001>
module attributes {stable_mosaic.version = 11 : i64} {
  func.func @conv_bn_kernel(%arg0: i32, %arg1: i32, %arg2: i32, %arg3: memref<256x128xbf16, #tpu.memory_space<vmem>>, %arg4: memref<128x128xbf16, #tpu.memory_space<vmem>>, %arg5: memref<1x128xf32, #tpu.memory_space<vmem>>, %arg6: memref<1x128xf32, #tpu.memory_space<vmem>>, %arg7: memref<256x128xbf16, #tpu.memory_space<vmem>>, %arg8: memref<256x128xf32, #tpu.memory_space<vmem>>) attributes {dimension_semantics = [#tpu.dimension_semantics<parallel>, #tpu.dimension_semantics<parallel>, #tpu.dimension_semantics<arbitrary>], iteration_bounds = array<i64: 2, 1, 1>, scalar_prefetch = 0 : i64, scratch_operands = 1 : i64, tpu.core_type = #tpu.core_type<tc>, window_params = [{transform_indices = @transform_0, window_bounds = array<i64: 256, 128>}, {transform_indices = @transform_1, window_bounds = array<i64: 128, 128>}, {transform_indices = @transform_2, window_bounds = array<i64: 1, 128>}, {transform_indices = @transform_3, window_bounds = array<i64: 1, 128>}, {transform_indices = @transform_4, window_bounds = array<i64: 256, 128>}]} {
    %c0_i32 = arith.constant 0 : i32
    %0 = arith.cmpi eq, %arg2, %c0_i32 : i32
    %1 = arith.extui %0 : i1 to i32
    %c0_i32_0 = arith.constant 0 : i32
    %2 = arith.cmpi ne, %1, %c0_i32_0 : i32
    scf.if %2 {
      %cst_10 = arith.constant 0.000000e+00 : f32
      %12 = vector.broadcast %cst_10 : f32 to vector<256x128xf32>
      %c0_11 = arith.constant 0 : index
      %c0_12 = arith.constant 0 : index
      %13 = vector.load %arg8[%c0_11, %c0_12] : memref<256x128xf32, #tpu.memory_space<vmem>>, vector<256x128xf32>
      tpu.vector_store %arg8[%c0_11, %c0_12], %12 {strides = array<i32>} : memref<256x128xf32, #tpu.memory_space<vmem>>, vector<256x128xf32>,
    } else {
    }
    %c0 = arith.constant 0 : index
    %c0_1 = arith.constant 0 : index
    %3 = vector.load %arg8[%c0, %c0_1] : memref<256x128xf32, #tpu.memory_space<vmem>>, vector<256x128xf32>
    %c0_2 = arith.constant 0 : index
    %c0_3 = arith.constant 0 : index
    %4 = vector.load %arg3[%c0_2, %c0_3] : memref<256x128xbf16, #tpu.memory_space<vmem>>, vector<256x128xbf16>
    %c0_4 = arith.constant 0 : index
    %c0_5 = arith.constant 0 : index
    %5 = vector.load %arg4[%c0_4, %c0_5] : memref<128x128xbf16, #tpu.memory_space<vmem>>, vector<128x128xbf16>
    %cst = arith.constant dense<0.000000e+00> : vector<256x128xf32>
    %6 = tpu.matmul %4, %5, %cst {dimension_numbers = #tpu.dot_dimension_numbers<[1], [0], [0], [1], [0, 0, 1, 1], [], []>} : vector<256x128xbf16>, vector<128x128xbf16>, vector<256x128xf32> -> vector<256x128xf32>
    %7 = arith.addf %3, %6 : vector<256x128xf32>
    %c0_6 = arith.constant 0 : index
    %c0_7 = arith.constant 0 : index
    %8 = vector.load %arg8[%c0_6, %c0_7] : memref<256x128xf32, #tpu.memory_space<vmem>>, vector<256x128xf32>
    tpu.vector_store %arg8[%c0_6, %c0_7], %7 {strides = array<i32>} : memref<256x128xf32, #tpu.memory_space<vmem>>, vector<256x128xf32>,
    %c0_i32_8 = arith.constant 0 : i32
    %9 = arith.cmpi eq, %arg2, %c0_i32_8 : i32
    %10 = arith.extui %9 : i1 to i32
    %c0_i32_9 = arith.constant 0 : i32
    %11 = arith.cmpi ne, %10, %c0_i32_9 : i32
    scf.if %11 {
      %c0_10 = arith.constant 0 : index
      %c0_11 = arith.constant 0 : index
      %12 = vector.load %arg8[%c0_10, %c0_11] : memref<256x128xf32, #tpu.memory_space<vmem>>, vector<256x128xf32>
      %c0_12 = arith.constant 0 : index
      %c0_13 = arith.constant 0 : index
      %13 = vector.load %arg5[%c0_12, %c0_13] : memref<1x128xf32, #tpu.memory_space<vmem>>, vector<1x128xf32>
      %14 = vector.broadcast %13 : vector<1x128xf32> to vector<256x128xf32>
      %15 = arith.mulf %12, %14 : vector<256x128xf32>
      %c0_14 = arith.constant 0 : index
      %c0_15 = arith.constant 0 : index
      %16 = vector.load %arg6[%c0_14, %c0_15] : memref<1x128xf32, #tpu.memory_space<vmem>>, vector<1x128xf32>
      %17 = vector.broadcast %16 : vector<1x128xf32> to vector<256x128xf32>
      %18 = arith.addf %15, %17 : vector<256x128xf32>
      %19 = arith.truncf %18 : vector<256x128xf32> to vector<256x128xbf16>
      %c0_16 = arith.constant 0 : index
      %c0_17 = arith.constant 0 : index
      %20 = vector.load %arg7[%c0_16, %c0_17] : memref<256x128xbf16, #tpu.memory_space<vmem>>, vector<256x128xbf16>
      tpu.vector_store %arg7[%c0_16, %c0_17], %19 {strides = array<i32>} : memref<256x128xbf16, #tpu.memory_space<vmem>>, vector<256x128xbf16>,
    } else {
    }
    return
  }
  func.func @transform_0(%arg0: i32, %arg1: i32, %arg2: i32) -> (i32, i32) {
    %c0_i32 = arith.constant 0 : i32
    return %arg0, %arg2 : i32, i32
  }
  func.func @transform_1(%arg0: i32, %arg1: i32, %arg2: i32) -> (i32, i32) {
    %c0_i32 = arith.constant 0 : i32
    return %arg2, %arg1 : i32, i32
  }
  func.func @transform_2(%arg0: i32, %arg1: i32, %arg2: i32) -> (i32, i32) {
    %c0_i32 = arith.constant 0 : i32
    %c0_i32_0 = arith.constant 0 : i32
    return %c0_i32, %arg1 : i32, i32
  }
  func.func @transform_3(%arg0: i32, %arg1: i32, %arg2: i32) -> (i32, i32) {
    %c0_i32 = arith.constant 0 : i32
    %c0_i32_0 = arith.constant 0 : i32
    return %c0_i32, %arg1 : i32, i32
  }
  func.func @transform_4(%arg0: i32, %arg1: i32, %arg2: i32) -> (i32, i32) {
    %c0_i32 = arith.constant 0 : i32
    return %arg0, %arg1 : i32, i32
  }
}

</mosaic_0001>

<bundles_post_ra>
// kernel: tpu_custom_call.1
= control target key start
LH: loop header
LB: loop body
LE: loop exit
PB: predicated region body
PF: predicated region fallthrough
CT: control target
= control target key end

     0   :  { %9 = vsyncpa [#allocation4], 0  ;;  %s2110_s0 = inlined_call_operand.hbm [shape: bf16[512,128], index: 0, kind: input, shape index: {}]   ;;  %s2111_s1 = inlined_call_operand.hbm [shape: bf16[128,128], index: 1, kind: input, shape index: {}]   ;;  %s2112_s2 = inlined_call_operand.vmem [shape: f32[1,128], index: 2, kind: input, shape index: {}]   ;;  %s2113_s3 = inlined_call_operand.vmem [shape: f32[1,128], index: 3, kind: input, shape index: {}]   ;;  %s2114_s4 = inlined_call_operand.hbm [shape: bf16[512,128], index: 4, kind: output, shape index: {}]  }
   0x1   :  { %11 = vsyncpa [#allocation4 + $0x1], 0 }
   0x2   :  { %12 = vsyncpa [#allocation7], 0 }
   0x3   :  { %13 = vsyncpa [#allocation5], 0 }
   0x4   :  { %15 = vsyncpa [#allocation5 + $0x1], 0  ;;  %s1770_s15 = smov 0   ;;  %s1772_s16 = smov 0  }
   0x5   :  { %s1774_s17 = smov 0   ;;  %s1776_s18 = smov 0  }
   0x6   :  { %s1778_s19 = smov 0   ;;  %s1780_s20 = smov 0  }
   0x7 LB: > { %s1197_s21 = sadd.s32 4294967295, %s1736_s20   ;;  %s1198_s22 = sadd.s32 4294967294, %s1736_s20   ;;  %s1736_s20 = sphi %s1780_s20, %s21_s20   ;;  %s1732_s19 = sphi %s1778_s19, %s2138_s19   ;;  %s1728_s18 = sphi %s1776_s18, %s2137_s18   ;;  %s1724_s17 = sphi %s1774_s17, %s2136_s17   ;;  %s1720_s16 = sphi %s1772_s16, %s2135_s16   ;;  %s1716_s15 = sphi %s1770_s15, %s2134_s15  }
   0x8   : > { %p62_p0 = scmp.ne.s32.totalorder %s1720_s16, %s1716_s15  ;;  %p1804_p1 = scmp.eq.s32.totalorder %s1197_s21, 0 }
   0x9   : > { %p1808_p2 = scmp.eq.s32.totalorder %s1197_s21, 1  ;;  %p174_p3 = scmp.eq.s32.totalorder %s1198_s22, 1 }
   0xa   : > { %s2119_s23 = scalar_select %p1804_p1, 1, 0 }
   0xb   : > { %s2120_s24 = scalar_select %p1808_p2, 1, 0 }
   0xc   : > { %p1814_p4 = por %p1804_p1, %p62_p0  ;;  %p1199_p5 = scmp.ge.s32.totalorder %s1736_s20, 1 }
   0xd   : > { %p1819_p6 = por %p174_p3, %p62_p0  ;;  %p181_p7 = scmp.lt.s32.totalorder %s1736_s20, 3 }
   0xe   : > { %s2121_s25 = scalar_select %p1814_p4, 1, 0 }
   0xf   : > { %s2122_s26 = scalar_select %p1819_p6, 1, 0 }
  0x10   : > { %p1824_p8 = pnand %p1199_p5, %p181_p7  ;;  %s1738_s28 = smov [#allocation6]  }
  0x11   : > { %s197_s29 = sshll.u32 %s1738_s28, 4  ;;  %s40_s5 = sadd.s32 1, %s1732_s19  ;;  %s198_s29 = int_to_ptr.vmem [resolvable:$true] %s197_s29 }
  0x12   : > { %s2123_s27 = scalar_select %p1824_p8, 1, 0 }
  0x13   : > { %p1499_p9 = pneg %p1824_p8  ;;  %s1592_s8 = scalar_lea.hbm %s2111_s1, 1024 }
  0x14   : > { %p1593_p12 = scmp.ne.s32.totalorder %s2111_s1, %s1592_s8  ;;  %p1599_p5 = scmp.lt.u32.totalorder %s1592_s8, %s2111_s1 }
  0x15   : > { %p1833_p11 = pnand %p1499_p9, %p1804_p1 }
  0x17   : > { %p1594_p13 = pneg %p1833_p11 }
  0x19   : > { %p1595_p0 = pnand %p1594_p13, %p1593_p12 }
  0x1b   : > { %p1596_p3 = pneg %p1595_p0 }
  0x1d   : > { %p1601_p7 = pnand %p1599_p5, %p1596_p3 }
  0x1f   : > { %1604 = shalt.err (!%p1601_p7)
}
  0x20   : > { %s1605_s13 = scalar_lea.vmem %s198_s29, 1024  ;;  %p1613_p1 = scmp.lt.s32.totalorder %s198_s29, %s198_s29 }
  0x21   : > { %p1606_p9 = scmp.ne.s32.totalorder %s198_s29, %s1605_s13  ;;  %p1614_p4 = scmp.lt.s32.totalorder %s1605_s13, %s1605_s13 }
  0x23   : > { %p1608_p10 = pnand %p1606_p9, %p1594_p13  ;;  %p1615_p8 = por %p1614_p4, %p1613_p1 }
  0x25   : > { %p1609_p6 = pneg %p1608_p10 }
  0x27   : > { %p1616_p2 = pnand %p1615_p8, %p1609_p6 }
  0x29   : > { %1619 = shalt.err (!%p1616_p2)
}
  0x2a   : > { %s1739_s14 = smov 64   ;;  %s1740_s21 = smov 4  }
  0x2b   : > { %1502 = dma.hbm_to_vmem [thread:$0]  (!%p1833_p11), %s2111_s1, 1024, %s198_s29, [#allocation7], %s1739_s14, %s1739_s14, %s1740_s21  }
  0x2c   : > { %p42_p1 = scmp.ge.s32.totalorder %s40_s5, 2  ;;  %s49_s6 = sadd.s32 1, %s1724_s17 }
  0x2d   : > { %p56_p2 = scmp.ne.s32.totalorder %s1724_s17, %s1720_s16  ;;  %p57_p4 = scmp.eq.s32.totalorder %s1736_s20, 0 }
  0x2e   : > { %s2140_s5 = smov (%p42_p1, %s40_s5), 0  ;;  %p2126_p8 = scmp.ne.s32.totalorder %s2120_s24, 0 }
  0x2f   : > { %p1863_p6 = por %p57_p4, %p56_p2  ;;  %s44_s8 = ssub.s32 %s1732_s19, %s2140_s5 }
  0x30   : > { %p1869_p10 = por %p2126_p8, %p56_p2  ;;  %p1512_p12 = scmp.lt.s32.totalorder %s1736_s20, 2 }
  0x31   : > { %p47_p11 = scmp.eq.s32.totalorder %s44_s8, 0  ;;  %s223_s29 = sand.u32 1, %s1724_s17  }
  0x32   : > { %s1204_s9 = sshll.u32 %s223_s29, 7  ;;  %s1274_s11 = sshll.u32 %s1732_s19, 11 }
  0x33   : > { %s1878_s10 = scalar_select %p47_p11, %s1724_s17, %s49_s6  }
  0x34   : > { %s1884_s22 = scalar_lea.hbm %s2110_s0, %s1274_s11  ;;  %s227_s24 = scalar_lea.vmem [#allocation3], %s1204_s9 }
  0x35   : > { %s235_s28 = sshll.u32 %s227_s24, 4  ;;  %p1890_p13 = pnand %p1512_p12, %p1863_p6  ;;  %s1886_s28 = int_to_ptr.vmem [resolvable:$true] %s235_s28 }
  0x36   : > { %s1894_s6 = scalar_lea.sflag [#allocation4], %s223_s29  ;;  %s1620_s12 = scalar_lea.hbm %s1884_s22, 2048 }
  0x37   : > { %p1621_p0 = scmp.ne.s32.totalorder %s1884_s22, %s1620_s12  ;;  %p1622_p3 = pneg %p1890_p13 }
  0x38   : > { %s1625_s7 = scalar_lea.hbm %s2110_s0, 4096  ;;  %p1626_p9 = scmp.lt.u32.totalorder %s1884_s22, %s2110_s0 }
  0x39   : > { %p1623_p5 = pnand %p1622_p3, %p1621_p0  ;;  %p1627_p1 = scmp.lt.u32.totalorder %s1625_s7, %s1620_s12 }
  0x3a   : > { %p1629_p4 = scmp.lt.u32.totalorder %s1620_s12, %s1884_s22 }
  0x3b   : > { %p1624_p7 = pneg %p1623_p5  ;;  %p1628_p2 = por %p1627_p1, %p1626_p9 }
  0x3d   : > { %p1630_p6 = por %p1629_p4, %p1628_p2 }
  0x3f   : > { %p1631_p8 = pnand %p1630_p6, %p1624_p7 }
  0x41   : > { %1634 = shalt.err (!%p1631_p8)
}
  0x42   : > { %s1635_s29 = scalar_lea.vmem %s1886_s28, 2048  ;;  %s1741_s9 = smov [#allocation3]  }
  0x43   : > { %p1636_p12 = scmp.ne.s32.totalorder %s1886_s28, %s1635_s29  ;;  %s1640_s11 = sshll.u32 %s1741_s9, 4  ;;  %s1641_s11 = int_to_ptr.vmem [resolvable:$false] %s1640_s11 }
  0x44   : > { %s1642_s13 = scalar_lea.vmem %s1641_s11, 4096  ;;  %p1643_p5 = scmp.lt.s32.totalorder %s1886_s28, %s1641_s11 }
  0x45   : > { %p1638_p11 = pnand %p1636_p12, %p1622_p3  ;;  %p1644_p9 = scmp.lt.s32.totalorder %s1642_s13, %s1635_s29 }
  0x47   : > { %p1639_p0 = pneg %p1638_p11  ;;  %p1645_p1 = por %p1644_p9, %p1643_p5 }
  0x49   : > { %p1646_p2 = pnand %p1645_p1, %p1639_p0 }
  0x4b   : > { %1649 = shalt.err (!%p1646_p2)
}
  0x4c   : > { %1506 = dma.hbm_to_vmem [thread:$0]  (!%p1890_p13), %s1884_s22, 2048, %s1886_s28, %s1894_s6, %s1739_s14, %s1739_s14, %s1740_s21  }
  0x4d   : > { %p2129_p3 = scmp.ne.s32.totalorder %s2123_s27, 0 }
  0x4e   : > { %s1928_s12 = sand.u32 (!%p2129_p3), 1, %s1720_s16   ;;  %p2130_p7 = scmp.ne.s32.totalorder (!%p2129_p3), %s2121_s25, 0 }
  0x4f   : > { %247 = sbr.rel (%p2129_p3) target bundleno = 383 (0x17f), region = 36  ;;  %s1208_s7 = sshll.u32 (!%p2129_p3), %s1928_s12, 7 }
  0x50   : > { %s250_s24 = scalar_lea.sflag (!%p2129_p3), [#allocation4], %s1928_s12  ;;  %s1934_s8 = scalar_lea.vmem (!%p2129_p3), [#allocation3], %s1208_s7 }
  0x56   : > { %1703 = dma.done.wait (%p2130_p7), %s250_s24, 2048  }
  0x57   : > { %1705 = vsyncadd (%p2130_p7), %s250_s24, 4294965248  ;;  %p2131_p13 = scmp.ne.s32.totalorder %s2119_s23, 0 }
  0x59   : > { %1707 = dma.done.wait (%p2131_p13), [#allocation7], 1024  }
  0x5a   : > { %1709 = vsyncadd (%p2131_p13), [#allocation7], 4294966272  ;;  %v1568_v0 = vld [vmem:[#allocation6] sm:$0xff]   ;;  %v1569_v1 = vld [vmem:[#allocation6 + $0x8] sm:$0xff]   ;;  %s1988_s21 = scalar_lea.vmem [#allocation8], %s1208_s7  ;;  %s1307_s22 = sshll.u32 %s1728_s18, 11 }
  0x5b   : > { %1427 = vmatprep.subr.bf16.mxu0 %v1568_v0  ;;  %1475 = vmatprep.subr.bf16.mxu1 %v1568_v0  ;;  %v1570_v2 = vld [vmem:[#allocation6 + $0x10] sm:$0xff]   ;;  %v1571_v3 = vld [vmem:[#allocation6 + $0x18] sm:$0xff]   ;;  %v1576_v4 = vld [vmem:[%s1934_s8] sm:$0xff]   ;;  %s1071_s28 = sshll.u32 %s1988_s21, 4  ;;  %s2055_s29 = scalar_lea.hbm %s2114_s4, %s1307_s22  ;;  %s2057_s28 = int_to_ptr.vmem [resolvable:$true] %s1071_s28 }
  0x5c   : > { %1428 = vmatpush3.bf16.msra.mxu0 %v1568_v0  ;;  %1483 = vmatpush3.bf16.msra.mxu1 %v1568_v0  ;;  %v1577_v5 = vld [vmem:[%s1934_s8 + $0x40] sm:$0xff]   ;;  %v1573_v7 = vld [vmem:[#allocation6 + $0x28] sm:$0xff]   ;;  %v1574_v8 = vld [vmem:[#allocation6 + $0x30] sm:$0xff]   ;;  %s1057_s9 = scalar_lea.sflag [#allocation5], %s1928_s12  ;;  %s1650_s11 = scalar_lea.vmem %s2057_s28, 2048 }
  0x5d   : > { %1429 = vmatprep.subr.bf16.mxu0 %v1569_v1  ;;  %1476 = vmatprep.subr.bf16.mxu1 %v1569_v1  ;;  %v1572_v6 = vld [vmem:[#allocation6 + $0x20] sm:$0xff]   ;;  %v1575_v9 = vld [vmem:[#allocation6 + $0x38] sm:$0xff]   ;;  %v1578_v10 = vld [vmem:[%s1934_s8 + $0x8] sm:$0xff]   ;;  %p1651_p4 = scmp.ne.s32.totalorder %s2057_s28, %s1650_s11  ;;  %s1742_s13 = smov [#allocation8]  }
  0x5e   : > { %1443 = vmatprep.mubr.bf16.mxu0 %v1576_v4  ;;  %1459 = vmatprep.mubr.bf16.mxu1 %v1577_v5  ;;  %v1579_v11 = vld [vmem:[%s1934_s8 + $0x48] sm:$0xff]   ;;  %v1580_v12 = vld [vmem:[%s1934_s8 + $0x10] sm:$0xff]   ;;  %v1582_v14 = vld [vmem:[%s1934_s8 + $0x18] sm:$0xff]   ;;  %s1654_s7 = sshll.u32 %s1742_s13, 4  ;;  %s1655_s7 = int_to_ptr.vmem [resolvable:$false] %s1654_s7 }
  0x5f   : > { %v1581_v13 = vld [vmem:[%s1934_s8 + $0x50] sm:$0xff]   ;;  %v1583_v15 = vld [vmem:[%s1934_s8 + $0x58] sm:$0xff]   ;;  %v1584_v16 = vld [vmem:[%s1934_s8 + $0x20] sm:$0xff]   ;;  %p1652_p6 = pnand %p1651_p4, %p1869_p10  ;;  %s1656_s24 = scalar_lea.vmem %s1655_s7, 4096 }
  0x60   : > { %1430 = vmatpush3.bf16.msra.mxu0 %v1569_v1  ;;  %1484 = vmatpush3.bf16.msra.mxu1 %v1569_v1  ;;  %v1585_v17 = vld [vmem:[%s1934_s8 + $0x60] sm:$0xff]   ;;  %v1586_v18 = vld [vmem:[%s1934_s8 + $0x28] sm:$0xff]   ;;  %v1588_v20 = vld [vmem:[%s1934_s8 + $0x30] sm:$0xff]   ;;  %p1657_p12 = scmp.lt.s32.totalorder %s2057_s28, %s1655_s7  ;;  %p1658_p11 = scmp.lt.s32.totalorder %s1656_s24, %s1650_s11 }
  0x61   : > { %1431 = vmatprep.subr.bf16.mxu0 %v1570_v2  ;;  %1477 = vmatprep.subr.bf16.mxu1 %v1570_v2  ;;  %v1587_v19 = vld [vmem:[%s1934_s8 + $0x68] sm:$0xff]   ;;  %v1589_v21 = vld [vmem:[%s1934_s8 + $0x70] sm:$0xff]   ;;  %v1590_v22 = vld [vmem:[%s1934_s8 + $0x38] sm:$0xff]   ;;  %p1653_p8 = pneg %p1652_p6 }
  0x62   : > { %v1591_v23 = vld [vmem:[%s1934_s8 + $0x78] sm:$0xff]   ;;  %v1963_v24 = vld [vmem:[%s2112_s2] ss:$0 sm:$0xff]  ;;  %p1659_p0 = por %p1658_p11, %p1657_p12 }
  0x63   : > { %v1970_v31 = vld [vmem:[%s2113_s3] ss:$0 sm:$0xff] }
  0x64   : > { %1432 = vmatpush3.bf16.msra.mxu0 %v1570_v2  ;;  %1485 = vmatpush3.bf16.msra.mxu1 %v1570_v2  ;;  %p1660_p5 = pnand %p1659_p0, %p1653_p8 }
  0x65   : > { %1433 = vmatprep.subr.bf16.mxu0 %v1571_v3  ;;  %1478 = vmatprep.subr.bf16.mxu1 %v1571_v3 }
  0x68   : > { %1434 = vmatpush3.bf16.msra.mxu0 %v1571_v3  ;;  %1486 = vmatpush3.bf16.msra.mxu1 %v1571_v3 }
  0x69   : > { %1435 = vmatprep.subr.bf16.mxu0 %v1572_v6  ;;  %1479 = vmatprep.subr.bf16.mxu1 %v1572_v6 }
  0x6c   : > { %1436 = vmatpush3.bf16.msra.mxu0 %v1572_v6  ;;  %1487 = vmatpush3.bf16.msra.mxu1 %v1572_v6 }
  0x6d   : > { %1437 = vmatprep.subr.bf16.mxu0 %v1573_v7  ;;  %1480 = vmatprep.subr.bf16.mxu1 %v1573_v7 }
  0x70   : > { %1438 = vmatpush3.bf16.msra.mxu0 %v1573_v7  ;;  %1488 = vmatpush3.bf16.msra.mxu1 %v1573_v7 }
  0x71   : > { %1439 = vmatprep.subr.bf16.mxu0 %v1574_v8  ;;  %1481 = vmatprep.subr.bf16.mxu1 %v1574_v8 }
  0x74   : > { %1440 = vmatpush3.bf16.msra.mxu0 %v1574_v8  ;;  %1489 = vmatpush3.bf16.msra.mxu1 %v1574_v8 }
  0x75   : > { %1441 = vmatprep.subr.bf16.mxu0 %v1575_v9  ;;  %1482 = vmatprep.subr.bf16.mxu1 %v1575_v9 }
  0x78   : > { %1442 = vmatpush3.bf16.msra.mxu0 %v1575_v9  ;;  %1490 = vmatpush3.bf16.msra.mxu1 %v1575_v9 }
  0x7b   : > { %1444 = vmatmul.mubr.bf16.vlgmr.msra.gmra.mrb[0].mxu0 %v1578_v10  ;;  %1460 = vmatmul.mubr.bf16.vlgmr.msra.gmra.mrb[0].mxu1 %v1579_v11 }
  0x7c   : > { %1447 = vmatprep.mubr.bf16.mxu0 %v1580_v12  ;;  %1463 = vmatprep.mubr.bf16.mxu1 %v1581_v13 }
  0x83   : > { %1448 = vmatmul.mubr.bf16.gmra.mrb[4].mxu0 %v1582_v14  ;;  %1464 = vmatmul.mubr.bf16.gmra.mrb[4].mxu1 %v1583_v15 }
  0x84   : > { %1451 = vmatprep.mubr.bf16.mxu0 %v1584_v16  ;;  %1467 = vmatprep.mubr.bf16.mxu1 %v1585_v17 }
  0x8b   : > { %1452 = vmatmul.mubr.bf16.gmra.mrb[8].mxu0 %v1586_v18  ;;  %1468 = vmatmul.mubr.bf16.gmra.mrb[8].mxu1 %v1587_v19 }
  0x8c   : > { %1455 = vmatprep.mubr.bf16.mxu0 %v1588_v20  ;;  %1471 = vmatprep.mubr.bf16.mxu1 %v1589_v21 }
  0x93   : > { %1456 = vmatmul.mubr.bf16.gmra.mrb[12].mxu0 %v1590_v22  ;;  %1472 = vmatmul.mubr.bf16.gmra.mrb[12].mxu1 %v1591_v23 }
 0x14e   : > { %v1445_v25 = vpop.f32.mrb[0].mxu0  ;;  %v1461_v26 = vpop.f32.mrb[0].mxu1 }
 0x14f   : > { %v827_v27 = vmul.f32 %v1445_v25, %v1963_v24  ;;  %v843_v28 = vmul.f32 %v1461_v26, %v1963_v24  ;;  %v592_v29 = vpop.f32.mrb[1].mxu0  ;;  %v656_v30 = vpop.f32.mrb[1].mxu1 }
 0x150   : > { %v825_v32 = vmul.f32 %v1963_v24, %v592_v29  ;;  %v841_v33 = vmul.f32 %v1963_v24, %v656_v30  ;;  %v1446_v34 = vpop.f32.mrb[2].mxu0  ;;  %v1462_v35 = vpop.f32.mrb[2].mxu1 }
 0x151   : > { %v828_v36 = vmul.f32 %v1446_v34, %v1963_v24  ;;  %v844_v37 = vmul.f32 %v1462_v35, %v1963_v24  ;;  %v595_v38 = vpop.f32.mrb[3].mxu0  ;;  %v659_v39 = vpop.f32.mrb[3].mxu1  ;;  %v866_v42 = vadd.f32 %v1970_v31, %v827_v27  ;;  %v882_v43 = vadd.f32 %v1970_v31, %v843_v28 }
 0x152   : > { %v826_v40 = vmul.f32 %v1963_v24, %v595_v38  ;;  %v842_v41 = vmul.f32 %v1963_v24, %v659_v39  ;;  %v864_v46 = vadd.f32 %v1970_v31, %v825_v32  ;;  %v880_v47 = vadd.f32 %v1970_v31, %v841_v33 }
 0x153   : > { %v867_v44 = vadd.f32 %v1970_v31, %v828_v36  ;;  %v883_v45 = vadd.f32 %v1970_v31, %v844_v37 }
 0x154   : > { %v865_v48 = vadd.f32 %v1970_v31, %v826_v40  ;;  %v881_v49 = vadd.f32 %v1970_v31, %v842_v41 }
 0x155   : > { %v1316_v50 = vpack.c.bf16 %v867_v44, %v866_v42  ;;  %v1356_v51 = vpack.c.bf16 %v883_v45, %v882_v43 }
 0x156   : > { %v1311_v52 = vpack.c.bf16 %v865_v48, %v864_v46  ;;  %v1351_v53 = vpack.c.bf16 %v881_v49, %v880_v47  ;;  %v1449_v54 = vpop.f32.mrb[4].mxu0  ;;  %v1465_v55 = vpop.f32.mrb[4].mxu1 }
 0x157   : > { %1388 = vst [vmem:[%s1988_s21 + $0x8] sm:$0xff] %v1316_v50   ;;  %1396 = vst [vmem:[%s1988_s21 + $0x48] sm:$0xff] %v1356_v51   ;;  %v831_v56 = vmul.f32 %v1449_v54, %v1963_v24  ;;  %v847_v57 = vmul.f32 %v1465_v55, %v1963_v24  ;;  %v608_v58 = vpop.f32.mrb[5].mxu0  ;;  %v672_v59 = vpop.f32.mrb[5].mxu1 }
 0x158   : > { %1312 = vst [vmem:[%s1988_s21] sm:$0xff] %v1311_v52   ;;  %1395 = vst [vmem:[%s1988_s21 + $0x40] sm:$0xff] %v1351_v53   ;;  %v829_v60 = vmul.f32 %v1963_v24, %v608_v58  ;;  %v845_v61 = vmul.f32 %v1963_v24, %v672_v59  ;;  %v1450_v62 = vpop.f32.mrb[6].mxu0  ;;  %v1466_v63 = vpop.f32.mrb[6].mxu1 }
 0x159   : > { %v832_v0 = vmul.f32 %v1450_v62, %v1963_v24  ;;  %v848_v1 = vmul.f32 %v1466_v63, %v1963_v24  ;;  %v611_v2 = vpop.f32.mrb[7].mxu0  ;;  %v675_v3 = vpop.f32.mrb[7].mxu1  ;;  %v870_v6 = vadd.f32 %v1970_v31, %v831_v56  ;;  %v886_v7 = vadd.f32 %v1970_v31, %v847_v57 }
 0x15a   : > { %v830_v4 = vmul.f32 %v1963_v24, %v611_v2  ;;  %v846_v5 = vmul.f32 %v1963_v24, %v675_v3  ;;  %v868_v10 = vadd.f32 %v1970_v31, %v829_v60  ;;  %v884_v11 = vadd.f32 %v1970_v31, %v845_v61 }
 0x15b   : > { %v871_v8 = vadd.f32 %v1970_v31, %v832_v0  ;;  %v887_v9 = vadd.f32 %v1970_v31, %v848_v1 }
 0x15c   : > { %v869_v12 = vadd.f32 %v1970_v31, %v830_v4  ;;  %v885_v13 = vadd.f32 %v1970_v31, %v846_v5 }
 0x15d   : > { %v1326_v14 = vpack.c.bf16 %v871_v8, %v870_v6  ;;  %v1366_v15 = vpack.c.bf16 %v887_v9, %v886_v7 }
 0x15e   : > { %v1321_v16 = vpack.c.bf16 %v869_v12, %v868_v10  ;;  %v1361_v17 = vpack.c.bf16 %v885_v13, %v884_v11  ;;  %v1453_v18 = vpop.f32.mrb[8].mxu0  ;;  %v1469_v19 = vpop.f32.mrb[8].mxu1 }
 0x15f   : > { %1390 = vst [vmem:[%s1988_s21 + $0x18] sm:$0xff] %v1326_v14   ;;  %1398 = vst [vmem:[%s1988_s21 + $0x58] sm:$0xff] %v1366_v15   ;;  %v835_v20 = vmul.f32 %v1453_v18, %v1963_v24  ;;  %v851_v21 = vmul.f32 %v1469_v19, %v1963_v24  ;;  %v624_v22 = vpop.f32.mrb[9].mxu0  ;;  %v688_v23 = vpop.f32.mrb[9].mxu1 }
 0x160   : > { %1389 = vst [vmem:[%s1988_s21 + $0x10] sm:$0xff] %v1321_v16   ;;  %1397 = vst [vmem:[%s1988_s21 + $0x50] sm:$0xff] %v1361_v17   ;;  %v833_v25 = vmul.f32 %v1963_v24, %v624_v22  ;;  %v849_v26 = vmul.f32 %v1963_v24, %v688_v23  ;;  %v1454_v27 = vpop.f32.mrb[10].mxu0  ;;  %v1470_v28 = vpop.f32.mrb[10].mxu1 }
 0x161   : > { %v836_v29 = vmul.f32 %v1454_v27, %v1963_v24  ;;  %v852_v30 = vmul.f32 %v1470_v28, %v1963_v24  ;;  %v627_v32 = vpop.f32.mrb[11].mxu0  ;;  %v691_v33 = vpop.f32.mrb[11].mxu1  ;;  %v874_v36 = vadd.f32 %v1970_v31, %v835_v20  ;;  %v890_v37 = vadd.f32 %v1970_v31, %v851_v21 }
 0x162   : > { %v834_v34 = vmul.f32 %v1963_v24, %v627_v32  ;;  %v850_v35 = vmul.f32 %v1963_v24, %v691_v33  ;;  %v872_v40 = vadd.f32 %v1970_v31, %v833_v25  ;;  %v888_v41 = vadd.f32 %v1970_v31, %v849_v26 }
 0x163   : > { %v875_v38 = vadd.f32 %v1970_v31, %v836_v29  ;;  %v891_v39 = vadd.f32 %v1970_v31, %v852_v30 }
 0x164   : > { %v873_v42 = vadd.f32 %v1970_v31, %v834_v34  ;;  %v889_v43 = vadd.f32 %v1970_v31, %v850_v35 }
 0x165   : > { %v1336_v44 = vpack.c.bf16 %v875_v38, %v874_v36  ;;  %v1376_v45 = vpack.c.bf16 %v891_v39, %v890_v37 }
 0x166   : > { %v1331_v46 = vpack.c.bf16 %v873_v42, %v872_v40  ;;  %v1371_v47 = vpack.c.bf16 %v889_v43, %v888_v41  ;;  %v1457_v48 = vpop.f32.mrb[12].mxu0  ;;  %v1473_v49 = vpop.f32.mrb[12].mxu1 }
 0x167   : > { %1392 = vst [vmem:[%s1988_s21 + $0x28] sm:$0xff] %v1336_v44   ;;  %1400 = vst [vmem:[%s1988_s21 + $0x68] sm:$0xff] %v1376_v45   ;;  %v839_v50 = vmul.f32 %v1457_v48, %v1963_v24  ;;  %v855_v51 = vmul.f32 %v1473_v49, %v1963_v24  ;;  %v640_v52 = vpop.f32.mrb[13].mxu0  ;;  %v704_v53 = vpop.f32.mrb[13].mxu1 }
 0x168   : > { %1391 = vst [vmem:[%s1988_s21 + $0x20] sm:$0xff] %v1331_v46   ;;  %1399 = vst [vmem:[%s1988_s21 + $0x60] sm:$0xff] %v1371_v47   ;;  %v837_v54 = vmul.f32 %v1963_v24, %v640_v52  ;;  %v853_v55 = vmul.f32 %v1963_v24, %v704_v53  ;;  %v1458_v56 = vpop.f32.mrb[14].mxu0  ;;  %v1474_v57 = vpop.f32.mrb[14].mxu1 }
 0x169   : > { %v840_v58 = vmul.f32 %v1458_v56, %v1963_v24  ;;  %v856_v59 = vmul.f32 %v1474_v57, %v1963_v24  ;;  %v643_v60 = vpop.f32.mrb[15].mxu0  ;;  %v707_v61 = vpop.f32.mrb[15].mxu1  ;;  %v878_v0 = vadd.f32 %v1970_v31, %v839_v50  ;;  %v894_v1 = vadd.f32 %v1970_v31, %v855_v51 }
 0x16a   : > { %v838_v62 = vmul.f32 %v1963_v24, %v643_v60  ;;  %v854_v63 = vmul.f32 %v1963_v24, %v707_v61  ;;  %v876_v4 = vadd.f32 %v1970_v31, %v837_v54  ;;  %v892_v5 = vadd.f32 %v1970_v31, %v853_v55 }
 0x16b   : > { %v879_v2 = vadd.f32 %v1970_v31, %v840_v58  ;;  %v895_v3 = vadd.f32 %v1970_v31, %v856_v59 }
 0x16c   : > { %v877_v24 = vadd.f32 %v1970_v31, %v838_v62  ;;  %v893_v6 = vadd.f32 %v1970_v31, %v854_v63 }
 0x16d   : > { %v1346_v7 = vpack.c.bf16 %v879_v2, %v878_v0  ;;  %v1386_v8 = vpack.c.bf16 %v895_v3, %v894_v1 }
 0x16e   : > { %v1341_v9 = vpack.c.bf16 %v877_v24, %v876_v4  ;;  %v1381_v10 = vpack.c.bf16 %v893_v6, %v892_v5 }
 0x16f   : > { %1394 = vst [vmem:[%s1988_s21 + $0x38] sm:$0xff] %v1346_v7   ;;  %1402 = vst [vmem:[%s1988_s21 + $0x78] sm:$0xff] %v1386_v8  }
 0x170   : > { %1393 = vst [vmem:[%s1988_s21 + $0x30] sm:$0xff] %v1341_v9   ;;  %1401 = vst [vmem:[%s1988_s21 + $0x70] sm:$0xff] %v1381_v10  }
 0x171   : > { %1663 = shalt.err (!%p1660_p5)
}
 0x172   : > { %s1664_s8 = scalar_lea.hbm %s2055_s29, 2048  ;;  %s1668_s27 = scalar_lea.hbm %s2114_s4, 4096 }
 0x173   : > { %p1665_p9 = scmp.ne.s32.totalorder %s2055_s29, %s1664_s8  ;;  %p1669_p3 = scmp.lt.u32.totalorder %s2055_s29, %s2114_s4 }
 0x174   : > { %p1670_p7 = scmp.lt.u32.totalorder %s1668_s27, %s1664_s8  ;;  %p1672_p4 = scmp.lt.u32.totalorder %s1664_s8, %s2055_s29 }
 0x175   : > { %p1666_p1 = pnand %p1665_p9, %p1869_p10 }
 0x176   : > { %p1671_p13 = por %p1670_p7, %p1669_p3 }
 0x177   : > { %p1667_p2 = pneg %p1666_p1 }
 0x178   : > { %p1673_p6 = por %p1672_p4, %p1671_p13 }
 0x17a   : > { %p1674_p8 = pnand %p1673_p6, %p1667_p2 }
 0x17c   : > { %1677 = shalt.err (!%p1674_p8)
}
 0x17d   : > { %s1743_s22 = smov 64   ;;  %s1744_s18 = smov 4  }
 0x17e   : > { %1497 = dma.vmem_to_hbm [thread:$0]  (%p1869_p10), %s2057_s28, 2048, %s2055_s29, %s1057_s9, %s1743_s22, %s1743_s22, %s1744_s18  }
 0x17f PF: > { %s1086_s6 = sand.u32 1, %s1716_s15   ;;  %p2132_p12 = scmp.ne.s32.totalorder %s2122_s26, 0 }
 0x180   : > { %p2133_p11 = scmp.ge.s32.totalorder %s1736_s20, 2  ;;  %s1087_s11 = scalar_lea.sflag [#allocation5], %s1086_s6 }
 0x182   : > { %p1508_p0 = pnand %p2133_p11, %p2132_p12 }
 0x184   : > { %1711 = dma.done.wait (!%p1508_p0), %s1087_s11, 2048  }
 0x185   : > { %1713 = vsyncadd (!%p1508_p0), %s1087_s11, 4294965248  ;;  %s21_s20 = sadd.s32 1, %s1736_s20   ;;  %s2134_s15 = smov %s1720_s16 }
 0x186   : > { %p18_p5 = scmp.ge.s32.totalorder %s21_s20, 4   ;;  %s2135_s16 = smov %s1724_s17 }
 0x187   : > { %s2136_s17 = smov %s1878_s10  ;;  %s2137_s18 = smov %s1732_s19 }
 0x188   : > { %s2138_s19 = smov %s2140_s5  ;;  %20 = sbr.rel (!%p18_p5) target bundleno = 7 (0x7), region = 100 }
 0x18f   :  { %1092 = vsyncpa [#allocation4], 1 }
 0x190   :  { %1094 = vsyncpa [#allocation4 + $0x1], 1 }
 0x191   :  { %1095 = vsyncpa [#allocation7], 1 }
 0x192   :  { %1096 = vsyncpa [#allocation5], 1 }
 0x193   :  { %1098 = vsyncpa [#allocation5 + $0x1], 1 }

</bundles_post_ra>
